<compile_context>
chip_gen: v5e
topology: v5e:2x2
jax: 0.10.0
libtpu: 0.0.40
codegen_flags: <defaults>
</compile_context>

<pallas_src>
import functools

import jax
import jax.numpy as jnp
from jax.experimental import pallas as pl
from jax.experimental.pallas import tpu as pltpu


def _r8(n):
    return ((n + 7) // 8) * 8


def _slab_layout(planes, cout, cin):
    """Row offsets (all multiples of 8 sublanes) for the packed parameter slab."""
    rp, rc = _r8(planes), _r8(cout)
    offs = {
        'wd': 0,
        'wh0': rp, 'wh1': 2 * rp, 'wh2': 3 * rp,
        'ww0': 4 * rp, 'ww1': 5 * rp, 'ww2': 6 * rp,
        'wu': 7 * rp,
        'b1': 7 * rp + rc,
        'bh': 7 * rp + rc + rp,
        'bw': 7 * rp + rc + 2 * rp,
        'b2': 7 * rp + rc + 3 * rp,
    }
    rows = offs['b2'] + rc
    cols = max(cin, planes)
    return offs, rows, cols


def _pick_batch_tile(n, target=8):
    """Largest divisor of n <= target; prefer >= 2 grid steps (v7x megacore sharding)."""
    best = 1
    for bt in range(1, min(n, target) + 1):
        if n % bt == 0:
            best = bt
    if n // best < 2:
        for bt in range(best - 1, 0, -1):
            if n % bt == 0 and n // bt >= 2:
                return bt
    return best


# ---------------------------------------------------------------------------
# Fused AxialBlock kernel: one grid step == B_T batch samples, fully VMEM-resident
# ---------------------------------------------------------------------------
def _axial_block_kernel(x_ref, p_ref, o_ref, *, H, W, HW, planes, cin, cout, offs):
    """
    x_ref : (Cin, B_T*HW)   activations, channels on sublanes, flat spatial (lane-dense)
    p_ref : (rows, cols)    packed params: folded conv weights + BN shifts (8-aligned rows)
    o_ref : (Cout, B_T*HW)
    """
    f32 = jnp.float32
    L = x_ref.shape[1]                     # B_T * HW lanes in this tile
    x = x_ref[...].astype(f32)             # (Cin, L)

    # --- carve packed parameters (static, 8-aligned sublane offsets) --------------
    wd = p_ref[offs['wd']:offs['wd'] + planes, 0:cin]           # conv_down  (BN1 folded)
    wh0 = p_ref[offs['wh0']:offs['wh0'] + planes, 0:planes]     # H-conv taps (BNh folded)
    wh1 = p_ref[offs['wh1']:offs['wh1'] + planes, 0:planes]
    wh2 = p_ref[offs['wh2']:offs['wh2'] + planes, 0:planes]
    ww0 = p_ref[offs['ww0']:offs['ww0'] + planes, 0:planes]     # W-conv taps (BNw folded)
    ww1 = p_ref[offs['ww1']:offs['ww1'] + planes, 0:planes]
    ww2 = p_ref[offs['ww2']:offs['ww2'] + planes, 0:planes]
    wu = p_ref[offs['wu']:offs['wu'] + cout, 0:planes]          # conv_up    (BN2 folded)
    b1 = p_ref[offs['b1']:offs['b1'] + planes, 0:1]             # BN shifts
    bh = p_ref[offs['bh']:offs['bh'] + planes, 0:1]
    bw = p_ref[offs['bw']:offs['bw'] + planes, 0:1]
    b2 = p_ref[offs['b2']:offs['b2'] + cout, 0:1]

    # --- per-sample boundary masks from iota (no mask inputs, handful of VPU ops) --
    pos = jax.lax.broadcasted_iota(jnp.int32, (1, L), 1)
    hpos = pos % HW                        # flat position within a sample
    wpos = pos % W                         # column index within a row
    m_up = hpos >= W                       # a (h-1) neighbour exists
    m_dn = hpos < (HW - W)                 # a (h+1) neighbour exists
    m_lf = wpos != 0                       # a (w-1) neighbour exists
    m_rt = wpos != (W - 1)                 # a (w+1) neighbour exists

    # --- conv_down (quaternion 1x1) + bn1 + relu ------------------------------------
    o1 = jnp.maximum(jnp.dot(wd, x, preferred_element_type=f32) + b1, 0.0)   # (planes, L)

    # --- hight_block: 3-tap conv along H (+-W lanes via XLU roll + boundary mask) ---
    up = jnp.where(m_up, pltpu.roll(o1, W, axis=1), 0.0)        # value at h-1 (0 at h==0)
    dn = jnp.where(m_dn, pltpu.roll(o1, L - W, axis=1), 0.0)    # value at h+1 (0 at h==H-1)
    o2 = (jnp.dot(wh0, up, preferred_element_type=f32)
          + jnp.dot(wh1, o1, preferred_element_type=f32)
          + jnp.dot(wh2, dn, preferred_element_type=f32)
          + bh)                                                 # (planes, L), no relu

    # --- width_block: 3-tap conv along W (+-1 lane via XLU roll + mask) + relu ------
    lf = jnp.where(m_lf, pltpu.roll(o2, 1, axis=1), 0.0)
    rt = jnp.where(m_rt, pltpu.roll(o2, L - 1, axis=1), 0.0)
    o3 = (jnp.dot(ww0, lf, preferred_element_type=f32)
          + jnp.dot(ww1, o2, preferred_element_type=f32)
          + jnp.dot(ww2, rt, preferred_element_type=f32)
          + bw)
    o3 = jnp.maximum(o3, 0.0)                                   # (planes, L)

    # --- conv_up (quaternion 1x1) + bn2 + residual + relu ---------------------------
    o4 = jnp.dot(wu, o3, preferred_element_type=f32) + b2 + x
    o_ref[...] = jnp.maximum(o4, 0.0).astype(o_ref.dtype)


def axial_block_forward(x, p, *, batch_tile=8):
    """x: NCHW float32. Returns NCHW, same shape as x (stride=1, expansion=2, no downsample)."""
    N, C, H, W = x.shape
    planes = p['w_down'].shape[0]
    cout = p['w_up'].shape[0]
    assert cout == C, "residual add requires inplanes == planes * expansion"
    HW = H * W
    f32 = jnp.float32

    # Fold inference-mode BN scales into the (linear) conv weights; keep only the shifts.
    wd = p['bn1_scale'][:, None] * p['w_down']                                  # (planes, C)
    wh = [p['bnh_scale'][:, None] * p['w_h'][:, :, k] for k in range(3)]
    ww = [p['bnw_scale'][:, None] * p['w_w'][:, :, k] for k in range(3)]
    wu = p['bn2_scale'][:, None] * p['w_up']                                    # (C, planes)

    # Pack everything into ONE 8-row-aligned slab: 2 input DMA descriptors per step.
    offs, rows, cols = _slab_layout(planes, cout, C)
    slab = jnp.zeros((rows, cols), f32)

    def put(s, r, m):
        return s.at[r:r + m.shape[0], :m.shape[1]].set(m)

    slab = put(slab, offs['wd'], wd)
    slab = put(slab, offs['wh0'], wh[0])
    slab = put(slab, offs['wh1'], wh[1])
    slab = put(slab, offs['wh2'], wh[2])
    slab = put(slab, offs['ww0'], ww[0])
    slab = put(slab, offs['ww1'], ww[1])
    slab = put(slab, offs['ww2'], ww[2])
    slab = put(slab, offs['wu'], wu)
    slab = put(slab, offs['b1'], p['bn1_shift'].reshape(planes, 1))
    slab = put(slab, offs['bh'], p['bnh_shift'].reshape(planes, 1))
    slab = put(slab, offs['bw'], p['bnw_shift'].reshape(planes, 1))
    slab = put(slab, offs['b2'], p['bn2_shift'].reshape(cout, 1))

    # Channel-major, lane-dense layout: (C, N*HW). XLA-side layout plumbing only.
    x_t = jnp.transpose(x.reshape(N, C, HW), (1, 0, 2)).reshape(C, N * HW)

    bt = _pick_batch_tile(N, batch_tile)     # samples per grid step (sweepable 8..32)
    L = bt * HW                              # lanes per step: multiple of HW=256
    grid = (N // bt,)

    kernel = functools.partial(_axial_block_kernel, H=H, W=W, HW=HW,
                               planes=planes, cin=C, cout=cout, offs=offs)

    out_t = pl.pallas_call(
        kernel,
        out_shape=jax.ShapeDtypeStruct((cout, N * HW), x.dtype),
        grid=grid,
        in_specs=[
            pl.BlockSpec((C, L), lambda i: (0, i)),         # activations, lane tile = bt*HW
            pl.BlockSpec((rows, cols), lambda i: (0, 0)),   # packed weights + BN shifts
        ],
        out_specs=pl.BlockSpec((cout, L), lambda i: (0, i)),
        compiler_params=pltpu.CompilerParams(
            dimension_semantics=("parallel",),      # lane/batch tiles shard across v7x's 2 TCs
            vmem_limit_bytes=32 * 1024 * 1024,      # safe on v5e/v6e/v7x; tile sized well below
        ),
    )(x_t, slab)

    out = out_t.reshape(cout, N, HW).transpose(1, 0, 2).reshape(N, cout, H, W)
    return out


# ---------------------------------------------------------------------------
# Parameter construction (deterministic, in-script)
# ---------------------------------------------------------------------------
def make_quaternion_1x1_weight(key, in_ch, out_ch, scale=0.1):
    """Hamilton-product combined weight for a 1x1 QuaternionConv: (out_ch, in_ch)."""
    assert in_ch % 4 == 0 and out_ch % 4 == 0
    ko, ki = out_ch // 4, in_ch // 4
    r, i, j, k = (scale * jax.random.normal(kk, (ko, ki), jnp.float32)
                  for kk in jax.random.split(key, 4))
    rows = [
        jnp.concatenate([r, -i, -j, -k], axis=1),
        jnp.concatenate([i, r, -k, j], axis=1),
        jnp.concatenate([j, k, r, -i], axis=1),
        jnp.concatenate([k, -j, i, r], axis=1),
    ]
    return jnp.concatenate(rows, axis=0)


def make_vectormap_weight(key, in_ch, out_ch, ksize=3, scale=0.1):
    """Block-circulant combined weight for VectorMapConv(3, ...): (out_ch, in_ch, k)."""
    nc = 3
    assert in_ch % nc == 0 and out_ch % nc == 0
    ko, ki = out_ch // nc, in_ch // nc
    comps = [scale * jax.random.normal(kk, (ko, ki, ksize), jnp.float32)
             for kk in jax.random.split(key, nc)]
    rows = [jnp.concatenate([comps[(j - i) % nc] for j in range(nc)], axis=1)
            for i in range(nc)]
    return jnp.concatenate(rows, axis=0)


def make_bn_params(key, c, eps=1e-5):
    kg, kb = jax.random.split(key)
    gamma = 1.0 + 0.1 * jax.random.normal(kg, (c,), jnp.float32)
    beta = 0.1 * jax.random.normal(kb, (c,), jnp.float32)
    running_mean = jnp.zeros((c,), jnp.float32)
    running_var = jnp.ones((c,), jnp.float32)
    s = gamma / jnp.sqrt(running_var + eps)
    return s, beta - running_mean * s


# ---------------------------------------------------------------------------
# Pure-JAX NCHW reference (mirrors the PyTorch forward)
# ---------------------------------------------------------------------------
def reference_forward(x, p):
    def bn(y, s, b):
        return y * s[None, :, None, None] + b[None, :, None, None]

    out = jnp.einsum('oc,nchw->nohw', p['w_down'], x)
    out = jax.nn.relu(bn(out, p['bn1_scale'], p['bn1_shift']))

    H = out.shape[2]
    xp = jnp.pad(out, ((0, 0), (0, 0), (1, 1), (0, 0)))
    oh = sum(jnp.einsum('oc,nchw->nohw', p['w_h'][:, :, k], xp[:, :, k:k + H, :])
             for k in range(3))
    oh = bn(oh, p['bnh_scale'], p['bnh_shift'])

    W = oh.shape[3]
    xp = jnp.pad(oh, ((0, 0), (0, 0), (0, 0), (1, 1)))
    ow = sum(jnp.einsum('oc,nchw->nohw', p['w_w'][:, :, k], xp[:, :, :, k:k + W])
             for k in range(3))
    ow = jax.nn.relu(bn(ow, p['bnw_scale'], p['bnw_shift']))

    o2 = jnp.einsum('oc,nchw->nohw', p['w_up'], ow)
    o2 = bn(o2, p['bn2_scale'], p['bn2_shift']) + x
    return jax.nn.relu(o2)


if __name__ == "__main__":
    key = jax.random.PRNGKey(0)
    keys = jax.random.split(key, 10)

    # AxialBlock(inplanes=24, planes=12): expansion=2 so output channels == inplanes.
    # (channels chosen divisible by 4 for QuaternionConv and by 3 for VectorMapConv)
    N, inplanes, planes, H, W = 2, 24, 12, 16, 16

    x = jax.random.normal(keys[0], (N, inplanes, H, W), jnp.float32)

    params = {
        'w_down': make_quaternion_1x1_weight(keys[1], inplanes, planes),       # (12, 24)
        'w_up': make_quaternion_1x1_weight(keys[2], planes, planes * 2),       # (24, 12)
        'w_h': make_vectormap_weight(keys[3], planes, planes, 3),              # (12, 12, 3)
        'w_w': make_vectormap_weight(keys[4], planes, planes, 3),              # (12, 12, 3)
    }
    params['bn1_scale'], params['bn1_shift'] = make_bn_params(keys[5], planes)
    params['bnh_scale'], params['bnh_shift'] = make_bn_params(keys[6], planes)
    params['bnw_scale'], params['bnw_shift'] = make_bn_params(keys[7], planes)
    params['bn2_scale'], params['bn2_shift'] = make_bn_params(keys[8], planes * 2)

    fwd = jax.jit(axial_block_forward)
    out = jax.block_until_ready(fwd(x, params))
    assert out.shape == (N, inplanes, H, W), out.shape

    ref = jax.block_until_ready(reference_forward(x, params))
    err = float(jnp.max(jnp.abs(out - ref)))
    assert err < 1e-4, f"max abs error vs reference: {err}"

    print("KERNEL_OK")
</pallas_src>

<mosaic_0001>
module attributes {stable_mosaic.version = 11 : i64} {
  func.func @_axial_block_kernel(%arg0: i32, %arg1: memref<24x256xf32, #tpu.memory_space<vmem>>, %arg2: memref<208x24xf32, #tpu.memory_space<vmem>>, %arg3: memref<24x256xf32, #tpu.memory_space<vmem>>) attributes {dimension_semantics = [#tpu.dimension_semantics<parallel>], iteration_bounds = array<i64: 2>, scalar_prefetch = 0 : i64, scratch_operands = 0 : i64, tpu.core_type = #tpu.core_type<tc>, window_params = [{transform_indices = @transform_0, window_bounds = array<i64: 24, 256>}, {pipeline_mode = #tpu.pipeline_mode<synchronous>, transform_indices = @transform_1, window_bounds = array<i64: 208, 24>}, {transform_indices = @transform_2, window_bounds = array<i64: 24, 256>}]} {
    %c0 = arith.constant 0 : index
    %c0_0 = arith.constant 0 : index
    %0 = vector.load %arg1[%c0, %c0_0] : memref<24x256xf32, #tpu.memory_space<vmem>>, vector<24x256xf32>
    %c0_1 = arith.constant 0 : index
    %c0_2 = arith.constant 0 : index
    %1 = vector.load %arg2[%c0_1, %c0_2] : memref<208x24xf32, #tpu.memory_space<vmem>>, vector<12x24xf32>
    %c16 = arith.constant 16 : index
    %c0_3 = arith.constant 0 : index
    %2 = vector.load %arg2[%c16, %c0_3] : memref<208x24xf32, #tpu.memory_space<vmem>>, vector<12x12xf32>
    %c32 = arith.constant 32 : index
    %c0_4 = arith.constant 0 : index
    %3 = vector.load %arg2[%c32, %c0_4] : memref<208x24xf32, #tpu.memory_space<vmem>>, vector<12x12xf32>
    %c48 = arith.constant 48 : index
    %c0_5 = arith.constant 0 : index
    %4 = vector.load %arg2[%c48, %c0_5] : memref<208x24xf32, #tpu.memory_space<vmem>>, vector<12x12xf32>
    %c64 = arith.constant 64 : index
    %c0_6 = arith.constant 0 : index
    %5 = vector.load %arg2[%c64, %c0_6] : memref<208x24xf32, #tpu.memory_space<vmem>>, vector<12x12xf32>
    %c80 = arith.constant 80 : index
    %c0_7 = arith.constant 0 : index
    %6 = vector.load %arg2[%c80, %c0_7] : memref<208x24xf32, #tpu.memory_space<vmem>>, vector<12x12xf32>
    %c96 = arith.constant 96 : index
    %c0_8 = arith.constant 0 : index
    %7 = vector.load %arg2[%c96, %c0_8] : memref<208x24xf32, #tpu.memory_space<vmem>>, vector<12x12xf32>
    %c112 = arith.constant 112 : index
    %c0_9 = arith.constant 0 : index
    %8 = vector.load %arg2[%c112, %c0_9] : memref<208x24xf32, #tpu.memory_space<vmem>>, vector<24x12xf32>
    %c136 = arith.constant 136 : index
    %c0_10 = arith.constant 0 : index
    %9 = vector.load %arg2[%c136, %c0_10] : memref<208x24xf32, #tpu.memory_space<vmem>>, vector<12x1xf32>
    %c152 = arith.constant 152 : index
    %c0_11 = arith.constant 0 : index
    %10 = vector.load %arg2[%c152, %c0_11] : memref<208x24xf32, #tpu.memory_space<vmem>>, vector<12x1xf32>
    %c168 = arith.constant 168 : index
    %c0_12 = arith.constant 0 : index
    %11 = vector.load %arg2[%c168, %c0_12] : memref<208x24xf32, #tpu.memory_space<vmem>>, vector<12x1xf32>
    %c184 = arith.constant 184 : index
    %c0_13 = arith.constant 0 : index
    %12 = vector.load %arg2[%c184, %c0_13] : memref<208x24xf32, #tpu.memory_space<vmem>>, vector<24x1xf32>
    %13 = tpu.iota {dimensions = array<i32: 1>} : vector<1x256xi32>
    %c256_i32 = arith.constant 256 : i32
    %c0_i32 = arith.constant 0 : i32
    %14 = arith.cmpi eq, %c256_i32, %c0_i32 : i32
    %c1_i32 = arith.constant 1 : i32
    %15 = arith.select %14, %c1_i32, %c256_i32 : i32
    %16 = vector.broadcast %15 : i32 to vector<1x256xi32>
    %17 = arith.remsi %13, %16 : vector<1x256xi32>
    %c0_i32_14 = arith.constant 0 : i32
    %18 = vector.broadcast %c0_i32_14 : i32 to vector<1x256xi32>
    %19 = arith.cmpi ne, %17, %18 : vector<1x256xi32>
    %c0_i32_15 = arith.constant 0 : i32
    %20 = vector.broadcast %c0_i32_15 : i32 to vector<1x256xi32>
    %21 = arith.cmpi slt, %17, %20 : vector<1x256xi32>
    %c0_i32_16 = arith.constant 0 : i32
    %22 = arith.cmpi slt, %15, %c0_i32_16 : i32
    %23 = vector.broadcast %22 : i1 to vector<1x256xi1>
    %24 = vector.broadcast %23 : vector<1x256xi1> to vector<1x256xi1>
    %25 = arith.xori %21, %24 : vector<1x256xi1>
    %26 = arith.andi %25, %19 : vector<1x256xi1>
    %27 = vector.broadcast %15 : i32 to vector<1x256xi32>
    %28 = arith.addi %17, %27 : vector<1x256xi32>
    %29 = arith.select %26, %28, %17 : vector<1x256xi1>, vector<1x256xi32>
    %c16_i32 = arith.constant 16 : i32
    %c0_i32_17 = arith.constant 0 : i32
    %30 = arith.cmpi eq, %c16_i32, %c0_i32_17 : i32
    %c1_i32_18 = arith.constant 1 : i32
    %31 = arith.select %30, %c1_i32_18, %c16_i32 : i32
    %32 = vector.broadcast %31 : i32 to vector<1x256xi32>
    %33 = arith.remsi %13, %32 : vector<1x256xi32>
    %c0_i32_19 = arith.constant 0 : i32
    %34 = vector.broadcast %c0_i32_19 : i32 to vector<1x256xi32>
    %35 = arith.cmpi ne, %33, %34 : vector<1x256xi32>
    %c0_i32_20 = arith.constant 0 : i32
    %36 = vector.broadcast %c0_i32_20 : i32 to vector<1x256xi32>
    %37 = arith.cmpi slt, %33, %36 : vector<1x256xi32>
    %c0_i32_21 = arith.constant 0 : i32
    %38 = arith.cmpi slt, %31, %c0_i32_21 : i32
    %39 = vector.broadcast %38 : i1 to vector<1x256xi1>
    %40 = vector.broadcast %39 : vector<1x256xi1> to vector<1x256xi1>
    %41 = arith.xori %37, %40 : vector<1x256xi1>
    %42 = arith.andi %41, %35 : vector<1x256xi1>
    %43 = vector.broadcast %31 : i32 to vector<1x256xi32>
    %44 = arith.addi %33, %43 : vector<1x256xi32>
    %45 = arith.select %42, %44, %33 : vector<1x256xi1>, vector<1x256xi32>
    %c16_i32_22 = arith.constant 16 : i32
    %46 = vector.broadcast %c16_i32_22 : i32 to vector<1x256xi32>
    %47 = arith.cmpi sge, %29, %46 : vector<1x256xi32>
    %c240_i32 = arith.constant 240 : i32
    %48 = vector.broadcast %c240_i32 : i32 to vector<1x256xi32>
    %49 = arith.cmpi slt, %29, %48 : vector<1x256xi32>
    %c0_i32_23 = arith.constant 0 : i32
    %50 = vector.broadcast %c0_i32_23 : i32 to vector<1x256xi32>
    %51 = arith.cmpi ne, %45, %50 : vector<1x256xi32>
    %c15_i32 = arith.constant 15 : i32
    %52 = vector.broadcast %c15_i32 : i32 to vector<1x256xi32>
    %53 = arith.cmpi ne, %45, %52 : vector<1x256xi32>
    %cst = arith.constant dense<0.000000e+00> : vector<12x256xf32>
    %54 = tpu.matmul %1, %0, %cst {dimension_numbers = #tpu.dot_dimension_numbers<[1], [0], [0], [1], [0, 0, 1, 1], [], []>} : vector<12x24xf32>, vector<24x256xf32>, vector<12x256xf32> -> vector<12x256xf32>
    %55 = vector.broadcast %9 : vector<12x1xf32> to vector<12x256xf32>
    %56 = arith.addf %54, %55 : vector<12x256xf32>
    %cst_24 = arith.constant 0.000000e+00 : f32
    %57 = vector.broadcast %cst_24 : f32 to vector<12x256xf32>
    %58 = arith.maximumf %56, %57 : vector<12x256xf32>
    %c16_i32_25 = arith.constant 16 : i32
    %59 = tpu.dynamic_rotate %58 by %c16_i32_25 dim 1 : vector<12x256xf32>, i32 -> vector<12x256xf32>
    %cst_26 = arith.constant 0.000000e+00 : f32
    %60 = vector.shape_cast %47 : vector<1x256xi1> to vector<1x256xi1>
    %61 = vector.broadcast %60 : vector<1x256xi1> to vector<12x256xi1>
    %62 = vector.broadcast %cst_26 : f32 to vector<12x256xf32>
    %63 = arith.select %61, %59, %62 : vector<12x256xi1>, vector<12x256xf32>
    %c240_i32_27 = arith.constant 240 : i32
    %64 = tpu.dynamic_rotate %58 by %c240_i32_27 dim 1 : vector<12x256xf32>, i32 -> vector<12x256xf32>
    %cst_28 = arith.constant 0.000000e+00 : f32
    %65 = vector.shape_cast %49 : vector<1x256xi1> to vector<1x256xi1>
    %66 = vector.broadcast %65 : vector<1x256xi1> to vector<12x256xi1>
    %67 = vector.broadcast %cst_28 : f32 to vector<12x256xf32>
    %68 = arith.select %66, %64, %67 : vector<12x256xi1>, vector<12x256xf32>
    %cst_29 = arith.constant dense<0.000000e+00> : vector<12x256xf32>
    %69 = tpu.matmul %2, %63, %cst_29 {dimension_numbers = #tpu.dot_dimension_numbers<[1], [0], [0], [1], [0, 0, 1, 1], [], []>} : vector<12x12xf32>, vector<12x256xf32>, vector<12x256xf32> -> vector<12x256xf32>
    %cst_30 = arith.constant dense<0.000000e+00> : vector<12x256xf32>
    %70 = tpu.matmul %3, %58, %cst_30 {dimension_numbers = #tpu.dot_dimension_numbers<[1], [0], [0], [1], [0, 0, 1, 1], [], []>} : vector<12x12xf32>, vector<12x256xf32>, vector<12x256xf32> -> vector<12x256xf32>
    %71 = arith.addf %69, %70 : vector<12x256xf32>
    %cst_31 = arith.constant dense<0.000000e+00> : vector<12x256xf32>
    %72 = tpu.matmul %4, %68, %cst_31 {dimension_numbers = #tpu.dot_dimension_numbers<[1], [0], [0], [1], [0, 0, 1, 1], [], []>} : vector<12x12xf32>, vector<12x256xf32>, vector<12x256xf32> -> vector<12x256xf32>
    %73 = arith.addf %71, %72 : vector<12x256xf32>
    %74 = vector.broadcast %10 : vector<12x1xf32> to vector<12x256xf32>
    %75 = arith.addf %73, %74 : vector<12x256xf32>
    %c1_i32_32 = arith.constant 1 : i32
    %76 = tpu.dynamic_rotate %75 by %c1_i32_32 dim 1 : vector<12x256xf32>, i32 -> vector<12x256xf32>
    %cst_33 = arith.constant 0.000000e+00 : f32
    %77 = vector.shape_cast %51 : vector<1x256xi1> to vector<1x256xi1>
    %78 = vector.broadcast %77 : vector<1x256xi1> to vector<12x256xi1>
    %79 = vector.broadcast %cst_33 : f32 to vector<12x256xf32>
    %80 = arith.select %78, %76, %79 : vector<12x256xi1>, vector<12x256xf32>
    %c255_i32 = arith.constant 255 : i32
    %81 = tpu.dynamic_rotate %75 by %c255_i32 dim 1 : vector<12x256xf32>, i32 -> vector<12x256xf32>
    %cst_34 = arith.constant 0.000000e+00 : f32
    %82 = vector.shape_cast %53 : vector<1x256xi1> to vector<1x256xi1>
    %83 = vector.broadcast %82 : vector<1x256xi1> to vector<12x256xi1>
    %84 = vector.broadcast %cst_34 : f32 to vector<12x256xf32>
    %85 = arith.select %83, %81, %84 : vector<12x256xi1>, vector<12x256xf32>
    %cst_35 = arith.constant dense<0.000000e+00> : vector<12x256xf32>
    %86 = tpu.matmul %5, %80, %cst_35 {dimension_numbers = #tpu.dot_dimension_numbers<[1], [0], [0], [1], [0, 0, 1, 1], [], []>} : vector<12x12xf32>, vector<12x256xf32>, vector<12x256xf32> -> vector<12x256xf32>
    %cst_36 = arith.constant dense<0.000000e+00> : vector<12x256xf32>
    %87 = tpu.matmul %6, %75, %cst_36 {dimension_numbers = #tpu.dot_dimension_numbers<[1], [0], [0], [1], [0, 0, 1, 1], [], []>} : vector<12x12xf32>, vector<12x256xf32>, vector<12x256xf32> -> vector<12x256xf32>
    %88 = arith.addf %86, %87 : vector<12x256xf32>
    %cst_37 = arith.constant dense<0.000000e+00> : vector<12x256xf32>
    %89 = tpu.matmul %7, %85, %cst_37 {dimension_numbers = #tpu.dot_dimension_numbers<[1], [0], [0], [1], [0, 0, 1, 1], [], []>} : vector<12x12xf32>, vector<12x256xf32>, vector<12x256xf32> -> vector<12x256xf32>
    %90 = arith.addf %88, %89 : vector<12x256xf32>
    %91 = vector.broadcast %11 : vector<12x1xf32> to vector<12x256xf32>
    %92 = arith.addf %90, %91 : vector<12x256xf32>
    %cst_38 = arith.constant 0.000000e+00 : f32
    %93 = vector.broadcast %cst_38 : f32 to vector<12x256xf32>
    %94 = arith.maximumf %92, %93 : vector<12x256xf32>
    %cst_39 = arith.constant dense<0.000000e+00> : vector<24x256xf32>
    %95 = tpu.matmul %8, %94, %cst_39 {dimension_numbers = #tpu.dot_dimension_numbers<[1], [0], [0], [1], [0, 0, 1, 1], [], []>} : vector<24x12xf32>, vector<12x256xf32>, vector<24x256xf32> -> vector<24x256xf32>
    %96 = vector.broadcast %12 : vector<24x1xf32> to vector<24x256xf32>
    %97 = arith.addf %95, %96 : vector<24x256xf32>
    %98 = arith.addf %97, %0 : vector<24x256xf32>
    %cst_40 = arith.constant 0.000000e+00 : f32
    %99 = vector.broadcast %cst_40 : f32 to vector<24x256xf32>
    %100 = arith.maximumf %98, %99 : vector<24x256xf32>
    %c0_41 = arith.constant 0 : index
    %c0_42 = arith.constant 0 : index
    %101 = vector.load %arg3[%c0_41, %c0_42] : memref<24x256xf32, #tpu.memory_space<vmem>>, vector<24x256xf32>
    tpu.vector_store %arg3[%c0_41, %c0_42], %100 {strides = array<i32>} : memref<24x256xf32, #tpu.memory_space<vmem>>, vector<24x256xf32>,
    return
  }
  func.func @transform_0(%arg0: i32) -> (i32, i32) {
    %c0_i32 = arith.constant 0 : i32
    %c0_i32_0 = arith.constant 0 : i32
    return %c0_i32, %arg0 : i32, i32
  }
  func.func @transform_1(%arg0: i32) -> (i32, i32) {
    %c0_i32 = arith.constant 0 : i32
    %c0_i32_0 = arith.constant 0 : i32
    %c0_i32_1 = arith.constant 0 : i32
    return %c0_i32, %c0_i32_0 : i32, i32
  }
  func.func @transform_2(%arg0: i32) -> (i32, i32) {
    %c0_i32 = arith.constant 0 : i32
    %c0_i32_0 = arith.constant 0 : i32
    return %c0_i32, %arg0 : i32, i32
  }
}

</mosaic_0001>

<bundles_post_ra>
// kernel: axial_block_forward.1
= control target key start
LH: loop header
LB: loop body
LE: loop exit
PB: predicated region body
PF: predicated region fallthrough
CT: control target
= control target key end

     0   :  { %s1144_s9 = smov 0   ;;  %s1146_s10 = smov 0   ;;  %s1417_s0 = inlined_call_operand.vmem [shape: f32[24,512], index: 0, kind: input, shape index: {}]   ;;  %s1418_s1 = inlined_call_operand.vmem [shape: f32[208,24], index: 1, kind: input, shape index: {}]   ;;  %s1419_s2 = inlined_call_operand.vmem [shape: f32[24,512], index: 2, kind: output, shape index: {}]  }
   0x1   :  { %s1148_s11 = smov 0  }
   0x2 LB: > { %s995_s12 = sadd.s32 4294967295, %s1122_s11   ;;  %s1161_s13 = sadd.s32 1, %s1122_s11   ;;  %s1122_s11 = sphi %s1148_s11, %s1429_s11   ;;  %s1118_s10 = sphi %s1146_s10, %s1428_s10   ;;  %s1114_s9 = sphi %s1144_s9, %s1427_s9  }
   0x3   : > { %s16_s14 = ssub.s32 %s1122_s11, %s1161_s13  ;;  %s19_s15 = sadd.s32 1, %s1118_s10 }
   0x4   : > { %p17_p0 = scmp.eq.s32.totalorder %s16_s14, 0  ;;  %p26_p1 = scmp.ne.s32.totalorder %s1118_s10, %s1114_s9 }
   0x5   : > { %p27_p2 = scmp.eq.s32.totalorder %s1122_s11, 0  ;;  %p77_p3 = scmp.eq.s32.totalorder %s995_s12, 1 }
   0x6   : > { %s1172_s16 = scalar_select %p17_p0, %s1118_s10, %s19_s15  }
   0x7   : > { %p28_p4 = por %p27_p2, %p26_p1  ;;  %p1174_p5 = por %p77_p3, %p26_p1 }
   0x8   : > { %p998_p6 = scmp.ge.s32.totalorder %s1122_s11, 2 }
   0xa   : > { %102 = sbr.rel (%p998_p6) target bundleno = 25 (0x19), region = 20 }
   0xf   : > { %105 = sbr.rel (!%p28_p4) target bundleno = 25 (0x19), region = 24  ;;  %s107_s18 = sand.u32 (%p28_p4), 1, %s1118_s10  }
  0x10   : > { %s1060_s19 = sshll.u32 (%p28_p4), %s1122_s11, 4  ;;  %s1066_s20 = smul.u32 (%p28_p4), 48, %s107_s18 }
  0x11   : > { %s112_s23 = scalar_lea.vmem (%p28_p4), %s1417_s0, %s1060_s19 }
  0x12   : > { %v125_v0 = vld [vmem:[%s112_s23] sm:$0xff] (%p28_p4)  ;;  %v127_v1 = vld [vmem:[%s112_s23 + $0x8] sm:$0xff] (%p28_p4)  ;;  %s109_s24 = scalar_lea.vmem (%p28_p4), [#allocation2], %s1066_s20 }
  0x13   : > { %v129_v2 = vld [vmem:[%s112_s23 + $0x20] sm:$0xff] (%p28_p4)  ;;  %126 = vst [vmem:[%s109_s24] sm:$0xff] (%p28_p4), %v125_v0  ;;  %v131_v3 = vld [vmem:[%s112_s23 + $0x28] sm:$0xff] (%p28_p4) }
  0x14   : > { %128 = vst [vmem:[%s109_s24 + $0x8] sm:$0xff] %v127_v1  ;;  %v133_v4 = vld [vmem:[%s112_s23 + $0x40] sm:$0xff]  ;;  %v135_v5 = vld [vmem:[%s112_s23 + $0x48] sm:$0xff] }
  0x15   : > { %130 = vst [vmem:[%s109_s24 + $0x10] sm:$0xff] %v129_v2 }
  0x16   : > { %132 = vst [vmem:[%s109_s24 + $0x18] sm:$0xff] %v131_v3 }
  0x17   : > { %134 = vst [vmem:[%s109_s24 + $0x20] sm:$0xff] %v133_v4 }
  0x18   : > { %136 = vst [vmem:[%s109_s24 + $0x28] sm:$0xff] %v135_v5 }
  0x19 PF: > { %p1001_p7 = scmp.ge.s32.totalorder %s1122_s11, 1  ;;  %p141_p8 = scmp.lt.s32.totalorder %s1122_s11, 3 }
  0x1b   : > { %p142_p9 = pnand %p1001_p7, %p141_p8 }
  0x1c   : > { %s148_s25 = sand.u32 (!%p142_p9), 1, %s1114_s9   ;;  %s1125_s8 = smov (!%p142_p9), 16  }
  0x1d   : > { %145 = sbr.rel (%p142_p9) target bundleno = 896 (0x380), region = 47  ;;  %s1126_s9 = smov (!%p142_p9), 112  }
  0x1e   : > { %s1190_s28 = smul.u32 (!%p142_p9), 48, %s148_s25  ;;  %s1127_s5 = smov (!%p142_p9), 127  }
  0x1f   : > { %s1128_s6 = smov (!%p142_p9), 1  }
  0x20   : > { %s150_s29 = scalar_lea.vmem (!%p142_p9), [#allocation2], %s1190_s28  ;;  %s1382_s20 = scalar_lea.vmem (!%p142_p9), [#allocation3], %s1190_s28 }
  0x22   : > { %v194_v6 = vld [vmem:[%s1418_s1 + $0x90] sm:$0xf]  ;;  %v1124_v7 = vmov 0   ;;  %v1195_v9 = vld [vmem:[%s150_s29 + $0x28] sm:$0xff]  ;;  %v1201_v11 = vld [vmem:[%s150_s29 + $0x18] sm:$0xff]  ;;  %vm271_vm0 = vcmask 195584   ;;  %v202_v33 = vlaneseq }
  0x23   : > { %1097 = vset.pattern.permute.xlu0 %v1124_v7  ;;  %1098 = vset.pattern.permute.xlu1 %v1124_v7  ;;  %v1193_v8 = vld [vmem:[%s150_s29 + $0x20] sm:$0xff]  ;;  %v1197_v10 = vld [vmem:[%s150_s29 + $0x10] sm:$0xff]  ;;  %v1205_v13 = vld [vmem:[%s150_s29 + $0x8] sm:$0xff]  ;;  %vm377_vm1 = vcmask 1043456   ;;  %vm370_vm2 = vcmask 97280   ;;  %s1061_s28 = sshll.u32 (%p1174_p5), %s995_s12, 4 }
  0x24   : > { %268 = vperm.xlu0 %1097, %v194_v6   ;;  %1099 = vset.pattern.permute.xlu2 %v1124_v7  ;;  %v1203_v12 = vld [vmem:[%s150_s29] sm:$0xff]  ;;  %v193_v15 = vld [vmem:[%s1418_s1 + $0x88] sm:$0xff]  ;;  %v195_v36 = vld [vmem:[%s1418_s1 + $0x98] sm:$0xff]  ;;  %v1238_v38 = vand.u32 127, %v202_v33  ;;  %s911_s23 = scalar_lea.vmem (%p1174_p5), %s1419_s2, %s1061_s28 }
  0x25   : > { %291 = vmatpush.msra.mxu0 %v1193_v8  ;;  %314 = vmatpush.msra.mxu1 %v1195_v9  ;;  %v176_v14 = vld [vmem:[%s1418_s1] sm:$0xff]  ;;  %v177_v16 = vld [vmem:[%s1418_s1 + $0x8] sm:$0xf]  ;;  %v178_v47 = vld [vmem:[%s1418_s1 + $0x10] sm:$0xff] }
  0x26   : > { %v180_v31 = vld [vmem:[%s1418_s1 + $0x20] sm:$0xff]  ;;  %v181_v32 = vld [vmem:[%s1418_s1 + $0x28] sm:$0xf]  ;;  %v209_v39 = vand.u32 255, %v1238_v38  ;;  %v1242_v41 = vadd.s32 128, %v1238_v38  ;;  %vm336_vm4 = vcmp.lt.s32.totalorder %v1238_v38, 16 }
  0x27   : > { %292 = vmatpush.msra.mxu0 %v1197_v10  ;;  %315 = vmatpush.msra.mxu1 %v1201_v11  ;;  %v196_v35 = vld [vmem:[%s1418_s1 + $0xa0] sm:$0xf]  ;;  %vm357_vm6 = vcmp.lt.s32.totalorder %v1238_v38, 112  ;;  %v179_v58 = vld [vmem:[%s1418_s1 + $0x18] sm:$0xf]  ;;  %v182_v61 = vld [vmem:[%s1418_s1 + $0x30] sm:$0xff] }
  0x28   : > { %vm253_vm3 = vcmp.ge.s32.totalorder %v209_v39, 16  ;;  %v216_v49 = vand.u32 255, %v1242_v41  ;;  %v183_v62 = vld [vmem:[%s1418_s1 + $0x38] sm:$0xf]  ;;  %v197_v33 = vld [vmem:[%s1418_s1 + $0xa8] sm:$0xff]  ;;  %vm593_vm9 = vcmp.lt.s32.totalorder %v1238_v38, 127 }
  0x29   : > { %293 = vmatpush.msra.mxu0 %v1203_v12  ;;  %316 = vmatpush.msra.mxu1 %v1205_v13  ;;  %vm572_vm10 = vcmp.lt.s32.totalorder %v1238_v38, 1 }
  0x2a   : > { %1002 = vmatmul.msk.f32.vlgmr.msra.gmra.mxu0 %vm271_vm0, %v176_v14  ;;  %1004 = vmatmul.msk.f32.vlgmr.msra.gmra.mxu1 %vm271_vm0, %v176_v14  ;;  %vm1253_vm5 = vcmp.lt.s32.totalorder %v216_v49, 240 }
  0x2c   : > { %263 = vperm.xlu0 %1097, %v193_v15  }
  0x32   : > { %1003 = vmatmul.msk.f32.gmra.mxu0 %vm271_vm0, %v177_v16  ;;  %1005 = vmatmul.msk.f32.gmra.mxu1 %vm271_vm0, %v177_v16 }
  0x96   : > { %v269_v17 = vpop.permute.xlu0 %268 }
  0x9e   : > { %v264_v18 = vpop.permute.xlu0 %263 }
  0xa7   : > { %v295_v19 = vpop.f32.mrf.mxu0  ;;  %v318_v20 = vpop.f32.mrf.mxu1 }
  0xa8   : > { %v296_v21 = vadd.f32 %v295_v19, %v264_v18  ;;  %v319_v23 = vadd.f32 %v318_v20, %v264_v18 }
  0xaa   : > { %v324_v22 = vmax.f32 %v296_v21, 0.0  ;;  %v325_v28 = vmax.f32 %v319_v23, 0.0 }
  0xac   : > { %328 = vrot.lane.b32.xlu2 %v324_v22, %s1125_s8 }
  0xaf   : > { %v298_v24 = vpop.f32.mrf.mxu0  ;;  %v321_v25 = vpop.f32.mrf.mxu1 }
  0xb0   : > { %v299_v26 = vadd.f32 %v298_v24, %v269_v17  ;;  %v322_v27 = vadd.f32 %v321_v25, %v269_v17 }
  0xb2   : > { %v326_v29 = vmax.f32 %v299_v26, 0.0  ;;  %v327_v30 = vmax.f32 %v322_v27, 0.0 }
  0xb4   : > { %1009 = vmatpush.msk.msra.mxu3 %vm377_vm1, %v327_v30  ;;  %351 = vrot.lane.b32.xlu0 %v326_v29, %s1126_s9 }
  0xb5   : > { %330 = vrot.lane.b32.xlu1 %v326_v29, %s1125_s8  ;;  %1006 = vmatpush.msk.msra.mxu2 %vm377_vm1, %v326_v29 }
  0xb6   : > { %332 = vrot.lane.b32.xlu2 %v325_v28, %s1125_s8  ;;  %422 = vmatpush.msra.mxu3 %v325_v28 }
  0xb7   : > { %399 = vmatpush.msra.mxu2 %v324_v22  ;;  %1010 = vmatmul.msk.f32.vlgmr.msra.gmra.mxu3 %vm370_vm2, %v180_v31 }
  0xb8   : > { %1007 = vmatmul.msk.f32.vlgmr.msra.gmra.mxu2 %vm370_vm2, %v180_v31  ;;  %v198_v31 = vld [vmem:[%s1418_s1 + $0xb0] sm:$0xf] }
  0xbc   : > { %353 = vrot.lane.b32.xlu0 %v325_v28, %s1126_s9 }
  0xbd   : > { %334 = vrot.lane.b32.xlu1 %v327_v30, %s1125_s8 }
  0xbe   : > { %349 = vrot.lane.b32.xlu2 %v324_v22, %s1126_s9 }
  0xbf   : > { %1011 = vmatmul.msk.f32.gmra.mxu3 %vm370_vm2, %v181_v32 }
  0xc0   : > { %1008 = vmatmul.msk.f32.gmra.mxu2 %vm370_vm2, %v181_v32  ;;  %v200_v32 = vld [vmem:[%s1418_s1 + $0xc0] sm:$0xff] }
  0xc5   : > { %355 = vrot.lane.b32.xlu1 %v327_v30, %s1126_s9 }
  0xc6   : > { %552 = vperm.xlu2 %1099, %v195_v36   ;;  %v186_v36 = vld [vmem:[%s1418_s1 + $0x50] sm:$0xff] }
  0xcd   : > { %557 = vperm.xlu1 %1098, %v196_v35   ;;  %v201_v35 = vld [vmem:[%s1418_s1 + $0xc8] sm:$0xff] }
 0x106   : > { %v329_v34 = vpop.permute.xlu2 %328 }
 0x110   : > { %v333_v42 = vpop.permute.xlu2 %332 }
 0x111   : > { %v337_v48 = vsel %vm336_vm4, %v329_v34, %v333_v42  ;;  %v339_v50 = vsel %vm336_vm4, %v333_v42, %v329_v34  ;;  %v199_v34 = vld [vmem:[%s1418_s1 + $0xb8] sm:$0xff]  ;;  %v240_v42 = vand.u32 15, %v1242_v41 }
 0x113   : > { %vm260_vm8 = vcmp.ne.s32.totalorder %v240_v42, 15  ;;  %vm1323_vm12 = vcmp.ne.s32.totalorder %v240_v42, 0  ;;  %v192_v42 = vld [vmem:[%s1418_s1 + $0x80] sm:$0xff] }
 0x118   : > { %v350_v56 = vpop.permute.xlu2 %349 }
 0x120   : > { %v553_v7 = vpop.permute.xlu2 %552 }
 0x126   : > { %v352_v40 = vpop.permute.xlu0 %351 }
 0x127   : > { %v331_v37 = vpop.permute.xlu1 %330 }
 0x12e   : > { %v354_v52 = vpop.permute.xlu0 %353 }
 0x12f   : > { %v335_v43 = vpop.permute.xlu1 %334  ;;  %v358_v59 = vsel %vm357_vm6, %v350_v56, %v354_v52  ;;  %v360_v60 = vsel %vm357_vm6, %v354_v52, %v350_v56 }
 0x130   : > { %v340_v44 = vsel %vm336_vm4, %v335_v43, %v331_v37  ;;  %v338_v45 = vsel %vm336_vm4, %v331_v37, %v335_v43  ;;  %v187_v37 = vld [vmem:[%s1418_s1 + $0x58] sm:$0xf] }
 0x131   : > { %1016 = vmatpush.msk.msrb.mxu3 %vm377_vm1, %v338_v45  ;;  %v347_v46 = vsel %vm253_vm3, %v340_v44, 0.0 }
 0x132   : > { %1012 = vmatpush.msk.msrb.mxu2 %vm377_vm1, %v347_v46 }
 0x133   : > { %480 = vmatpush.msrb.mxu3 %v337_v48 }
 0x134   : > { %1013 = vmatpush.msk.msrb.mxu2 %vm253_vm3, %v339_v50  ;;  %1017 = vmatmul.msk.f32.vlgmr.msrb.gmra.mxu3 %vm370_vm2, %v178_v47  ;;  %v188_v50 = vld [vmem:[%s1418_s1 + $0x60] sm:$0xff] }
 0x135   : > { %1014 = vmatmul.msk.f32.vlgmr.msrb.gmra.mxu2 %vm370_vm2, %v178_v47 }
 0x137   : > { %v356_v53 = vpop.permute.xlu1 %355 }
 0x138   : > { %v361_v54 = vsel %vm357_vm6, %v356_v53, %v352_v40  ;;  %v359_v55 = vsel %vm357_vm6, %v352_v40, %v356_v53  ;;  %v233_v40 = vand.u32 15, %v1238_v38 }
 0x139   : > { %1019 = vmatpush.msk.msrb.mxu0 %vm377_vm1, %v359_v55  ;;  %1062 = vmatpush.msk.msra.mxu2 %vm377_vm1, %v359_v55  ;;  %v369_v57 = vsel %vm1253_vm5, %v361_v54, 0.0 }
 0x13a   : > { %1022 = vmatpush.msk.msrb.mxu1 %vm377_vm1, %v369_v57  ;;  %1064 = vmatpush.msk.msra.mxu3 %vm377_vm1, %v369_v57  ;;  %v424_v63 = vpop.f32.mrf.mxu3  ;;  %vm259_vm7 = vcmp.ne.s32.totalorder %v233_v40, 15  ;;  %vm1319_vm11 = vcmp.ne.s32.totalorder %v233_v40, 0  ;;  %v191_v40 = vld [vmem:[%s1418_s1 + $0x78] sm:$0xff] }
 0x13b   : > { %515 = vmatpush.msrb.mxu0 %v358_v59  ;;  %1063 = vmatpush.msra.mxu2 %v358_v59  ;;  %v401_v0 = vpop.f32.mrf.mxu2 }
 0x13c   : > { %1018 = vmatmul.msk.f32.gmra.mxu3 %vm370_vm2, %v179_v58  ;;  %1023 = vmatpush.msk.msrb.mxu1 %vm1253_vm5, %v360_v60 }
 0x13d   : > { %1065 = vmatpush.msk.msra.mxu3 %vm1253_vm5, %v360_v60  ;;  %1015 = vmatmul.msk.f32.gmra.mxu2 %vm370_vm2, %v179_v58  ;;  %v189_v60 = vld [vmem:[%s1418_s1 + $0x68] sm:$0xf] }
 0x13e   : > { %1020 = vmatmul.msk.f32.vlgmr.msrb.gmra.mxu0 %vm370_vm2, %v182_v61  ;;  %1024 = vmatmul.msk.f32.vlgmr.msrb.gmra.mxu1 %vm370_vm2, %v182_v61 }
 0x13f   : > { %v558_v25 = vpop.permute.xlu1 %557 }
 0x142   : > { %v427_v1 = vpop.f32.mrf.mxu3 }
 0x143   : > { %v404_v2 = vpop.f32.mrf.mxu2 }
 0x144   : > { %1025 = vmatmul.msk.f32.vlgmr.msra.gmra.mxu3 %vm370_vm2, %v183_v62 }
 0x145   : > { %1021 = vmatmul.msk.f32.vlgmr.msra.gmra.mxu2 %vm370_vm2, %v183_v62 }
 0x1b7   : > { %v482_v3 = vpop.f32.mrf.mxu3 }
 0x1b8   : > { %v483_v4 = vadd.f32 %v482_v3, %v424_v63  ;;  %v459_v5 = vpop.f32.mrf.mxu2  ;;  %v184_v63 = vld [vmem:[%s1418_s1 + $0x40] sm:$0xff] }
 0x1b9   : > { %v460_v6 = vadd.f32 %v459_v5, %v401_v0 }
 0x1bb   : > { %v517_v14 = vpop.f32.mrf.mxu0  ;;  %v540_v15 = vpop.f32.mrf.mxu1 }
 0x1bc   : > { %v546_v16 = vadd.f32 %v517_v14, %v460_v6  ;;  %v547_v17 = vadd.f32 %v540_v15, %v483_v4 }
 0x1be   : > { %v560_v18 = vadd.f32 %v553_v7, %v546_v16  ;;  %v561_v19 = vadd.f32 %v553_v7, %v547_v17 }
 0x1bf   : > { %v485_v20 = vpop.f32.mrf.mxu3 }
 0x1c0   : > { %589 = vrot.lane.b32.xlu0 %v561_v19, %s1127_s5  ;;  %585 = vrot.lane.b32.xlu2 %v560_v18, %s1127_s5  ;;  %v462_v21 = vpop.f32.mrf.mxu2  ;;  %v486_v22 = vadd.f32 %v485_v20, %v427_v1 }
 0x1c1   : > { %v463_v23 = vadd.f32 %v462_v21, %v404_v2  ;;  %v185_v2 = vld [vmem:[%s1418_s1 + $0x48] sm:$0xf] }
 0x1c7   : > { %v543_v24 = vpop.f32.mrf.mxu3 }
 0x1c8   : > { %v549_v26 = vadd.f32 %v543_v24, %v486_v22  ;;  %v520_v27 = vpop.f32.mrf.mxu2 }
 0x1c9   : > { %v548_v28 = vadd.f32 %v520_v27, %v463_v23 }
 0x1ca   : > { %v563_v29 = vadd.f32 %v558_v25, %v549_v26 }
 0x1cb   : > { %v562_v30 = vadd.f32 %v558_v25, %v548_v28 }
 0x1cc   : > { %591 = vrot.lane.b32.xlu1 %v563_v29, %s1127_s5  ;;  %1029 = vmatpush.msk.msrb.mxu3 %vm377_vm1, %v563_v29 }
 0x1cd   : > { %570 = vrot.lane.b32.xlu2 %v563_v29, %s1128_s6  ;;  %587 = vrot.lane.b32.xlu0 %v562_v30, %s1127_s5 }
 0x1ce   : > { %1026 = vmatpush.msk.msrb.mxu2 %vm377_vm1, %v562_v30  ;;  %656 = vmatpush.msrb.mxu3 %v561_v19 }
 0x1cf   : > { %1030 = vmatmul.msk.f32.vlgmr.msrb.gmra.mxu3 %vm370_vm2, %v186_v36 }
 0x1d0   : > { %633 = vmatpush.msrb.mxu2 %v560_v18 }
 0x1d1   : > { %1027 = vmatmul.msk.f32.vlgmr.msrb.gmra.mxu2 %vm370_vm2, %v186_v36 }
 0x1d4   : > { %566 = vrot.lane.b32.xlu1 %v562_v30, %s1128_s6 }
 0x1d5   : > { %791 = vperm.xlu2 %1099, %v198_v31   ;;  %564 = vrot.lane.b32.xlu0 %v560_v18, %s1128_s6 }
 0x1d7   : > { %1031 = vmatmul.msk.f32.gmra.mxu3 %vm370_vm2, %v187_v37 }
 0x1d9   : > { %1028 = vmatmul.msk.f32.gmra.mxu2 %vm370_vm2, %v187_v37 }
 0x1dc   : > { %568 = vrot.lane.b32.xlu1 %v561_v19, %s1128_s6 }
 0x1dd   : > { %809 = vperm.xlu2 %1099, %v200_v32   ;;  %786 = vperm.xlu0 %1097, %v197_v33  }
 0x1e4   : > { %804 = vperm.xlu1 %1098, %v199_v34  }
 0x1e5   : > { %814 = vperm.xlu0 %1097, %v201_v35  }
 0x21a   : > { %v586_v43 = vpop.permute.xlu2 %585 }
 0x227   : > { %v571_v54 = vpop.permute.xlu2 %570 }
 0x22f   : > { %v792_v28 = vpop.permute.xlu2 %791 }
 0x232   : > { %v590_v39 = vpop.permute.xlu0 %589 }
 0x233   : > { %v594_v41 = vsel %vm593_vm9, %v586_v43, %v590_v39  ;;  %v596_v51 = vsel %vm593_vm9, %v590_v39, %v586_v43  ;;  %v190_v39 = vld [vmem:[%s1418_s1 + $0x70] sm:$0xff] }
 0x23e   : > { %v592_v44 = vpop.permute.xlu1 %591 }
 0x23f   : > { %v588_v45 = vpop.permute.xlu0 %587 }
 0x240   : > { %v595_v46 = vsel %vm593_vm9, %v588_v45, %v592_v44  ;;  %v597_v47 = vsel %vm593_vm9, %v592_v44, %v588_v45 }
 0x241   : > { %v604_v48 = vsel %vm259_vm7, %v595_v46, 0.0  ;;  %v605_v49 = vsel %vm260_vm8, %v597_v47, 0.0 }
 0x242   : > { %1040 = vmatpush.msk.msra.mxu2 %vm377_vm1, %v604_v48  ;;  %1044 = vmatpush.msk.msra.mxu3 %vm377_vm1, %v605_v49 }
 0x244   : > { %1041 = vmatpush.msk.msra.mxu2 %vm259_vm7, %v594_v41  ;;  %1045 = vmatpush.msk.msra.mxu3 %vm260_vm8, %v596_v51  ;;  %v810_v51 = vpop.permute.xlu2 %809 }
 0x245   : > { %1042 = vmatmul.msk.f32.vlgmr.msra.gmra.mxu2 %vm370_vm2, %v188_v50  ;;  %1046 = vmatmul.msk.f32.vlgmr.msra.gmra.mxu3 %vm370_vm2, %v188_v50 }
 0x246   : > { %v567_v55 = vpop.permute.xlu1 %566 }
 0x247   : > { %v574_v56 = vsel %vm572_vm10, %v567_v55, %v571_v54  ;;  %v576_v57 = vsel %vm572_vm10, %v571_v54, %v567_v55  ;;  %v565_v61 = vpop.permute.xlu0 %564 }
 0x248   : > { %v583_v58 = vsel %vm1319_vm11, %v576_v57, 0.0  ;;  %v584_v59 = vsel %vm1323_vm12, %v574_v56, 0.0 }
 0x249   : > { %1032 = vmatpush.msk.msra.mxu0 %vm377_vm1, %v583_v58  ;;  %1036 = vmatpush.msk.msra.mxu1 %vm377_vm1, %v584_v59 }
 0x24d   : > { %1043 = vmatmul.msk.f32.gmra.mxu2 %vm370_vm2, %v189_v60  ;;  %1047 = vmatmul.msk.f32.gmra.mxu3 %vm370_vm2, %v189_v60 }
 0x24e   : > { %v569_v62 = vpop.permute.xlu1 %568 }
 0x24f   : > { %v573_v0 = vsel %vm572_vm10, %v565_v61, %v569_v62  ;;  %v575_v1 = vsel %vm572_vm10, %v569_v62, %v565_v61  ;;  %v787_v29 = vpop.permute.xlu0 %786 }
 0x250   : > { %1033 = vmatpush.msk.msra.mxu0 %vm1319_vm11, %v575_v1  ;;  %1037 = vmatpush.msk.msra.mxu1 %vm1323_vm12, %v573_v0 }
 0x251   : > { %1034 = vmatmul.msk.f32.vlgmr.msra.gmra.mxu0 %vm370_vm2, %v184_v63  ;;  %1038 = vmatmul.msk.f32.vlgmr.msra.gmra.mxu1 %vm370_vm2, %v184_v63 }
 0x252   : > { %v658_v3 = vpop.f32.mrf.mxu3 }
 0x254   : > { %v635_v38 = vpop.f32.mrf.mxu2 }
 0x256   : > { %v805_v43 = vpop.permute.xlu1 %804 }
 0x257   : > { %v815_v58 = vpop.permute.xlu0 %814 }
 0x259   : > { %1035 = vmatmul.msk.f32.gmra.mxu0 %vm370_vm2, %v185_v2  ;;  %1039 = vmatmul.msk.f32.gmra.mxu1 %vm370_vm2, %v185_v2 }
 0x25a   : > { %v661_v5 = vpop.f32.mrf.mxu3 }
 0x25c   : > { %v638_v4 = vpop.f32.mrf.mxu2 }
 0x2c8   : > { %v751_v6 = vpop.f32.mrf.mxu2  ;;  %v774_v7 = vpop.f32.mrf.mxu3 }
 0x2ce   : > { %v693_v14 = vpop.f32.mrf.mxu0  ;;  %v716_v15 = vpop.f32.mrf.mxu1 }
 0x2cf   : > { %v694_v16 = vadd.f32 %v693_v14, %v635_v38  ;;  %v717_v17 = vadd.f32 %v716_v15, %v658_v3 }
 0x2d0   : > { %v754_v18 = vpop.f32.mrf.mxu2  ;;  %v777_v19 = vpop.f32.mrf.mxu3 }
 0x2d1   : > { %v780_v22 = vadd.f32 %v751_v6, %v694_v16  ;;  %v781_v23 = vadd.f32 %v774_v7, %v717_v17 }
 0x2d3   : > { %v794_v30 = vadd.f32 %v787_v29, %v780_v22  ;;  %v795_v31 = vadd.f32 %v787_v29, %v781_v23 }
 0x2d5   : > { %v798_v36 = vmax.f32 %v794_v30, 0.0  ;;  %v799_v37 = vmax.f32 %v795_v31, 0.0 }
 0x2d6   : > { %v696_v20 = vpop.f32.mrf.mxu0  ;;  %v719_v21 = vpop.f32.mrf.mxu1 }
 0x2d7   : > { %v697_v24 = vadd.f32 %v696_v20, %v638_v4  ;;  %v720_v25 = vadd.f32 %v719_v21, %v661_v5 }
 0x2d9   : > { %v782_v26 = vadd.f32 %v754_v18, %v697_v24  ;;  %v783_v27 = vadd.f32 %v777_v19, %v720_v25 }
 0x2db   : > { %v796_v32 = vadd.f32 %v792_v28, %v782_v26  ;;  %v797_v33 = vadd.f32 %v792_v28, %v783_v27 }
 0x2dd   : > { %v800_v34 = vmax.f32 %v796_v32, 0.0  ;;  %v801_v35 = vmax.f32 %v797_v33, 0.0 }
 0x2df   : > { %1048 = vmatpush.msk.msrb.mxu0 %vm377_vm1, %v800_v34  ;;  %1052 = vmatpush.msk.msrb.mxu1 %vm377_vm1, %v801_v35 }
 0x2e1   : > { %847 = vmatpush.msrb.mxu0 %v798_v36  ;;  %873 = vmatpush.msrb.mxu1 %v799_v37 }
 0x2e2   : > { %1049 = vmatmul.msk.f32.vlgmr.msrb.gmra.mxu0 %vm370_vm2, %v190_v39  ;;  %1053 = vmatmul.msk.f32.vlgmr.msrb.gmra.mxu1 %vm370_vm2, %v190_v39 }
 0x2ea   : > { %1050 = vmatmul.msk.f32.gmra.mxu0 %vm370_vm2, %v191_v40  ;;  %1054 = vmatmul.msk.f32.gmra.mxu1 %vm370_vm2, %v191_v40 }
 0x2f2   : > { %1051 = vmatmul.msk.f32.gmra.mxu0 %vm370_vm2, %v192_v42  ;;  %1055 = vmatmul.msk.f32.gmra.mxu1 %vm370_vm2, %v192_v42 }
 0x35f   : > { %v849_v44 = vpop.f32.mrf.mxu0  ;;  %v875_v45 = vpop.f32.mrf.mxu1 }
 0x360   : > { %v850_v46 = vadd.f32 %v849_v44, %v805_v43  ;;  %v876_v47 = vadd.f32 %v875_v45, %v805_v43 }
 0x362   : > { %v884_v48 = vadd.f32 %v850_v46, %v1203_v12  ;;  %v885_v49 = vadd.f32 %v876_v47, %v1205_v13 }
 0x364   : > { %v890_v50 = vmax.f32 %v884_v48, 0.0  ;;  %v891_v41 = vmax.f32 %v885_v49, 0.0 }
 0x366   : > { %896 = vst [vmem:[%s1382_s20] sm:$0xff] %v890_v50 }
 0x367   : > { %897 = vst [vmem:[%s1382_s20 + $0x8] sm:$0xff] %v891_v41  ;;  %v852_v52 = vpop.f32.mrf.mxu0  ;;  %v878_v53 = vpop.f32.mrf.mxu1 }
 0x368   : > { %v853_v54 = vadd.f32 %v852_v52, %v810_v51  ;;  %v879_v55 = vadd.f32 %v878_v53, %v810_v51 }
 0x36a   : > { %v886_v12 = vadd.f32 %v853_v54, %v1197_v10  ;;  %v887_v13 = vadd.f32 %v879_v55, %v1201_v11 }
 0x36c   : > { %v892_v56 = vmax.f32 %v886_v12, 0.0  ;;  %v893_v57 = vmax.f32 %v887_v13, 0.0 }
 0x36d   : > { %v924_v10 = vld [vmem:[%s1382_s20] sm:$0xff] (%p1174_p5) }
 0x36e   : > { %898 = vst [vmem:[%s1382_s20 + $0x10] sm:$0xff] %v892_v56 }
 0x36f   : > { %899 = vst [vmem:[%s1382_s20 + $0x18] sm:$0xff] %v893_v57  ;;  %v855_v59 = vpop.f32.mrf.mxu0  ;;  %v881_v60 = vpop.f32.mrf.mxu1 }
 0x370   : > { %v856_v61 = vadd.f32 %v855_v59, %v815_v58  ;;  %v882_v62 = vadd.f32 %v881_v60, %v815_v58  ;;  %925 = vst [vmem:[%s911_s23] sm:$0xff] (%p1174_p5), %v924_v10 }
 0x372   : > { %v888_v63 = vadd.f32 %v856_v61, %v1193_v8  ;;  %v889_v0 = vadd.f32 %v882_v62, %v1195_v9  ;;  %v926_v8 = vld [vmem:[%s1382_s20 + $0x8] sm:$0xff] (%p1174_p5) }
 0x373   : > { %908 = sbr.rel (!%p1174_p5) target bundleno = 896 (0x380), region = 55  ;;  %927 = vst [vmem:[%s911_s23 + $0x8] sm:$0xff] (%p1174_p5), %v926_v8 }
 0x374   : > { %v894_v1 = vmax.f32 %v888_v63, 0.0  ;;  %v895_v2 = vmax.f32 %v889_v0, 0.0 }
 0x375   : > { %v928_v9 = vld [vmem:[%s1382_s20 + $0x10] sm:$0xff] (%p1174_p5) }
 0x376   : > { %900 = vst [vmem:[%s1382_s20 + $0x20] sm:$0xff] %v894_v1  ;;  %v930_v11 = vld [vmem:[%s1382_s20 + $0x18] sm:$0xff] (%p1174_p5) }
 0x377   : > { %901 = vst [vmem:[%s1382_s20 + $0x28] sm:$0xff] %v895_v2 }
 0x378   : > { %929 = vst [vmem:[%s911_s23 + $0x20] sm:$0xff] %v928_v9 }
 0x379   : > { %931 = vst [vmem:[%s911_s23 + $0x28] sm:$0xff] %v930_v11 }
 0x37d   : > { %v932_v38 = vld [vmem:[%s1382_s20 + $0x20] sm:$0xff] }
 0x37e   : > { %v934_v3 = vld [vmem:[%s1382_s20 + $0x28] sm:$0xff]  ;;  %933 = vst [vmem:[%s911_s23 + $0x40] sm:$0xff] %v932_v38 }
 0x37f   : > { %935 = vst [vmem:[%s911_s23 + $0x48] sm:$0xff] %v934_v3 }
 0x380 PF: > { %p9_p10 = scmp.ge.s32.totalorder %s1161_s13, 4   ;;  %s1427_s9 = smov %s1118_s10 }
 0x381   : > { %s1428_s10 = smov %s1172_s16  ;;  %s1429_s11 = smov %s1161_s13 }
 0x382   :  { %11 = sbr.rel (!%p9_p10) target bundleno = 2 (0x2), region = 109 }

</bundles_post_ra>
